<compile_context>
chip_gen: v6e
topology: v6e:2x2x1
jax: 0.10.0
libtpu: 0.0.40
codegen_flags: <defaults>
</compile_context>

<pallas_src>
import functools

import jax
import jax.numpy as jnp
from jax.experimental import pallas as pl
from jax.experimental.pallas import tpu as pltpu

_LANE = 128
_SUB = 32          # row-tile multiple: covers f32(8) / bf16(16) / 8-bit(32) sublane tiling
_NEG_FILL = -1e4   # sigmoid(-1e4) == 0.0 in f32 -> padded logits are neutral


def _dice_kernel(rows_valid, tiles_per_core, has_partial,
                 x_ref, t_ref, out_ref, pt_acc, p_acc, t_acc):
    """Streaming sigmoid-dice partial sums.

    grid = (num_cores, tiles_per_core).  Outer axis is megacore-parallel; the
    inner axis accumulates into per-core (8,128) VMEM vreg accumulators, which
    are written out as per-core partials on the last inner step.
    """
    c = pl.program_id(0)
    i = pl.program_id(1)
    tr = x_ref.shape[0]
    # Unclamped global row-block index (int32; fine for any realistic N,
    # since it indexes 128-lane rows, not elements).
    blk = c * tiles_per_core + i
    row_start = blk * tr

    @pl.when(i == 0)
    def _init():
        pt_acc[...] = jnp.zeros_like(pt_acc)
        p_acc[...] = jnp.zeros_like(p_acc)
        t_acc[...] = jnp.zeros_like(t_acc)

    def _accumulate(p, t):
        # (tr,128) -> (tr//8, 8, 128): sum over axis 0 is pure vreg-wise VALU
        # adds (no cross-lane XLU work in the steady state).
        p3 = p.reshape(tr // 8, 8, _LANE)
        t3 = t.reshape(tr // 8, 8, _LANE)
        pt_acc[...] += jnp.sum(p3 * t3, axis=0)
        p_acc[...] += jnp.sum(p3, axis=0)
        t_acc[...] += jnp.sum(t3, axis=0)

    # Steady state: tile fully inside the valid rows -> no mask work at all.
    @pl.when(row_start + tr <= rows_valid)
    def _full_tile():
        p = jax.nn.sigmoid(x_ref[...].astype(jnp.float32))
        t = t_ref[...].astype(jnp.float32)
        _accumulate(p, t)

    if has_partial:
        # Only the single row-block straddling `rows_valid` pays for the mask;
        # the OOB tail of that block holds undefined data and must be zeroed.
        @pl.when(jnp.logical_and(row_start < rows_valid,
                                 row_start + tr > rows_valid))
        def _partial_tile():
            row = jax.lax.broadcasted_iota(jnp.int32, (tr, _LANE), 0)
            mask = ((row_start + row) < rows_valid).astype(jnp.float32)
            p = jax.nn.sigmoid(x_ref[...].astype(jnp.float32)) * mask
            t = t_ref[...].astype(jnp.float32) * mask
            _accumulate(p, t)

    # Blocks entirely past `rows_valid` (clamped duplicates) contribute nothing.

    @pl.when(i == tiles_per_core - 1)
    def _finalize():
        out_ref[0, 0] = pt_acc[...]
        out_ref[0, 1] = p_acc[...]
        out_ref[0, 2] = t_acc[...]


def dice_loss(inputs, targets, smooth=1.0, reduction="mean", *, max_block_rows=4096):
    """Binary sigmoid Dice loss (Pallas TPU). max_block_rows=8192 is fine on v6e/v7x."""
    # Match the PyTorch forward(): squeeze trailing singleton dim, flatten.
    if inputs.ndim == 2 and inputs.shape[1] == 1:
        inputs = inputs[:, 0]
    x = inputs.reshape(-1)
    t = targets.reshape(-1)
    # Float dtypes (f32/bf16) stream through untouched; ints/bools are upcast.
    if not jnp.issubdtype(x.dtype, jnp.floating):
        x = x.astype(jnp.float32)
    if not jnp.issubdtype(t.dtype, jnp.floating):
        t = t.astype(jnp.float32)

    n = int(x.shape[0])
    smooth = float(smooth)
    if n == 0:
        loss = jnp.float32(1.0 - smooth / smooth)  # == 0.0
        return loss * n if reduction == "sum" else loss

    rows = -(-n // _LANE)                         # cdiv(n, 128)
    pad = rows * _LANE - n
    if pad:
        # Rare path (N % 128 != 0): pad only to the next multiple of 128 with
        # neutral values, so the kernel never needs a per-lane mask.
        x = jnp.pad(x, (0, pad), constant_values=_NEG_FILL)
        t = jnp.pad(t, (0, pad), constant_values=0)
    # Zero-copy 2-D view (free reshape when no pad): last dim on the lane axis.
    x = x.reshape(rows, _LANE)
    t = t.reshape(rows, _LANE)

    max_block_rows = max(_SUB, (int(max_block_rows) // _SUB) * _SUB)
    tr = min(max_block_rows, -(-rows // _SUB) * _SUB)
    nblocks = -(-rows // tr)
    ncores = 2 if nblocks >= 2 else 1             # extra grid dim is harmless on 1-TC chips
    tiles_per_core = -(-nblocks // ncores)
    has_partial = (rows % tr) != 0

    def idx_map(c, i):
        # Clamp so redundant tail iterations re-fetch the last real block;
        # the in-kernel row_start guards make them contribute nothing.
        return (jnp.minimum(c * tiles_per_core + i, nblocks - 1), 0)

    kernel = functools.partial(_dice_kernel, rows, tiles_per_core, has_partial)

    partials = pl.pallas_call(
        kernel,
        out_shape=jax.ShapeDtypeStruct((ncores, 3, 8, _LANE), jnp.float32),
        grid=(ncores, tiles_per_core),
        in_specs=[
            pl.BlockSpec((tr, _LANE), idx_map),
            pl.BlockSpec((tr, _LANE), idx_map),
        ],
        out_specs=pl.BlockSpec((1, 3, 8, _LANE), lambda c, i: (c, 0, 0, 0)),
        scratch_shapes=[pltpu.VMEM((8, _LANE), jnp.float32)] * 3,
        compiler_params=pltpu.CompilerParams(
            dimension_semantics=("parallel", "arbitrary"),
            vmem_limit_bytes=32 * 1024 * 1024),
        cost_estimate=pl.CostEstimate(
            flops=6 * rows * _LANE,
            transcendentals=rows * _LANE,
            bytes_accessed=int(x.size * x.dtype.itemsize
                               + t.size * t.dtype.itemsize
                               + ncores * 3 * 8 * _LANE * 4)),
    )(x, t)

    # Tiny wrapper-side combine: sum per-core vreg partials, then dice formula.
    sums = jnp.sum(partials, axis=(0, 2, 3))      # (3,) = [I, P, T]
    inter, psum, tsum = sums[0], sums[1], sums[2]
    dice = (2.0 * inter + smooth) / (psum + tsum + smooth)
    loss = 1.0 - dice
    if reduction == "sum":
        return loss * n
    # 'mean' and 'none' both return the scalar dice loss (matches the module).
    return loss


def _dice_loss_ref(inputs, targets, smooth=1.0, reduction="mean"):
    """Pure-JAX reference mirroring the PyTorch DiceLoss module."""
    if inputs.ndim == 2 and inputs.shape[1] == 1:
        inputs = inputs[:, 0]
    probs = jax.nn.sigmoid(inputs.astype(jnp.float32)).reshape(-1)
    t = targets.reshape(-1).astype(jnp.float32)
    inter = jnp.sum(probs * t)
    dice = (2.0 * inter + smooth) / (jnp.sum(probs) + jnp.sum(t) + smooth)
    loss = 1.0 - dice
    if reduction == "sum":
        return loss * probs.shape[0]
    return loss


if __name__ == "__main__":
    key = jax.random.PRNGKey(0)
    k1, k2, k3, k4, k5, k6 = jax.random.split(key, 6)

    # Case 1: [N, 1] logits, N not a multiple of 128 (neutral pad + row mask),
    # default block size, single tile.
    N = 200
    logits = jax.random.normal(k1, (N, 1), dtype=jnp.float32) * 2.0
    targets = (jax.random.uniform(k2, (N,)) > 0.5).astype(jnp.float32)

    loss = jax.block_until_ready(dice_loss(logits, targets, smooth=1.0, reduction="mean"))
    ref = _dice_loss_ref(logits, targets, smooth=1.0, reduction="mean")
    assert jnp.allclose(loss, ref, rtol=1e-5, atol=1e-5), (loss, ref)

    loss_sum = jax.block_until_ready(dice_loss(logits, targets, reduction="sum"))
    ref_sum = _dice_loss_ref(logits, targets, reduction="sum")
    assert jnp.allclose(loss_sum, ref_sum, rtol=1e-5, atol=1e-4), (loss_sum, ref_sum)

    # Case 2: N multiple of 128 (zero-copy path), small block size to exercise
    # multiple tiles, the 2-way "parallel" core axis, a ragged final block and
    # a clamped/skipped duplicate block (rows=640, tr=256 -> 3 blocks on 2 cores).
    N2 = 640 * 128
    logits2 = jax.random.normal(k3, (N2,), dtype=jnp.float32)
    targets2 = (jax.random.uniform(k4, (N2,)) > 0.5).astype(jnp.float32)
    loss2 = jax.block_until_ready(dice_loss(logits2, targets2, smooth=1.0, max_block_rows=256))
    ref2 = _dice_loss_ref(logits2, targets2, smooth=1.0)
    assert jnp.allclose(loss2, ref2, rtol=1e-4, atol=1e-5), (loss2, ref2)

    # Case 3: N not a multiple of 128 AND multiple tiles (pad path + partial tile).
    N3 = 3 * 256 * 128 + 77
    logits3 = jax.random.normal(k5, (N3,), dtype=jnp.float32)
    targets3 = (jax.random.uniform(k6, (N3,)) > 0.5).astype(jnp.float32)
    loss3 = jax.block_until_ready(dice_loss(logits3, targets3, smooth=1.0, max_block_rows=256))
    ref3 = _dice_loss_ref(logits3, targets3, smooth=1.0)
    assert jnp.allclose(loss3, ref3, rtol=1e-4, atol=1e-5), (loss3, ref3)

    print("KERNEL_OK")
</pallas_src>

<mosaic_0001>
module attributes {stable_mosaic.version = 11 : i64} {
  func.func @_dice_kernel(%arg0: i32, %arg1: i32, %arg2: memref<32x128xf32, #tpu.memory_space<vmem>>, %arg3: memref<32x128xf32, #tpu.memory_space<vmem>>, %arg4: memref<1x3x8x128xf32, #tpu.memory_space<vmem>>, %arg5: memref<8x128xf32, #tpu.memory_space<vmem>>, %arg6: memref<8x128xf32, #tpu.memory_space<vmem>>, %arg7: memref<8x128xf32, #tpu.memory_space<vmem>>) attributes {dimension_semantics = [#tpu.dimension_semantics<parallel>, #tpu.dimension_semantics<arbitrary>], iteration_bounds = array<i64: 1, 1>, scalar_prefetch = 0 : i64, scratch_operands = 3 : i64, tpu.core_type = #tpu.core_type<tc>, window_params = [{transform_indices = @transform_0, window_bounds = array<i64: 32, 128>}, {transform_indices = @transform_1, window_bounds = array<i64: 32, 128>}, {transform_indices = @transform_2, window_bounds = array<i64: 1, 3, 8, 128>}]} {
    %c1_i32 = arith.constant 1 : i32
    %0 = arith.muli %arg0, %c1_i32 : i32
    %1 = arith.addi %0, %arg1 : i32
    %c32_i32 = arith.constant 32 : i32
    %2 = arith.muli %1, %c32_i32 : i32
    %c0_i32 = arith.constant 0 : i32
    %3 = arith.cmpi eq, %arg1, %c0_i32 : i32
    %4 = arith.extui %3 : i1 to i32
    %c0_i32_0 = arith.constant 0 : i32
    %5 = arith.cmpi ne, %4, %c0_i32_0 : i32
    scf.if %5 {
      %cst = arith.constant 0.000000e+00 : f32
      %19 = vector.broadcast %cst : f32 to vector<8x128xf32>
      %c0 = arith.constant 0 : index
      %c0_9 = arith.constant 0 : index
      %20 = vector.load %arg5[%c0, %c0_9] : memref<8x128xf32, #tpu.memory_space<vmem>>, vector<8x128xf32>
      tpu.vector_store %arg5[%c0, %c0_9], %19 {strides = array<i32>} : memref<8x128xf32, #tpu.memory_space<vmem>>, vector<8x128xf32>,
      %cst_10 = arith.constant 0.000000e+00 : f32
      %21 = vector.broadcast %cst_10 : f32 to vector<8x128xf32>
      %c0_11 = arith.constant 0 : index
      %c0_12 = arith.constant 0 : index
      %22 = vector.load %arg6[%c0_11, %c0_12] : memref<8x128xf32, #tpu.memory_space<vmem>>, vector<8x128xf32>
      tpu.vector_store %arg6[%c0_11, %c0_12], %21 {strides = array<i32>} : memref<8x128xf32, #tpu.memory_space<vmem>>, vector<8x128xf32>,
      %cst_13 = arith.constant 0.000000e+00 : f32
      %23 = vector.broadcast %cst_13 : f32 to vector<8x128xf32>
      %c0_14 = arith.constant 0 : index
      %c0_15 = arith.constant 0 : index
      %24 = vector.load %arg7[%c0_14, %c0_15] : memref<8x128xf32, #tpu.memory_space<vmem>>, vector<8x128xf32>
      tpu.vector_store %arg7[%c0_14, %c0_15], %23 {strides = array<i32>} : memref<8x128xf32, #tpu.memory_space<vmem>>, vector<8x128xf32>,
    } else {
    }
    %c32_i32_1 = arith.constant 32 : i32
    %6 = arith.addi %2, %c32_i32_1 : i32
    %c2_i32 = arith.constant 2 : i32
    %7 = arith.cmpi sle, %6, %c2_i32 : i32
    %8 = arith.extui %7 : i1 to i32
    %c0_i32_2 = arith.constant 0 : i32
    %9 = arith.cmpi ne, %8, %c0_i32_2 : i32
    scf.if %9 {
      %c0 = arith.constant 0 : index
      %c0_9 = arith.constant 0 : index
      %19 = vector.load %arg2[%c0, %c0_9] : memref<32x128xf32, #tpu.memory_space<vmem>>, vector<32x128xf32>
      %20 = arith.negf %19 : vector<32x128xf32>
      %21 = math.exp %20 : vector<32x128xf32>
      %cst = arith.constant 1.000000e+00 : f32
      %22 = vector.broadcast %cst : f32 to vector<32x128xf32>
      %23 = arith.addf %22, %21 : vector<32x128xf32>
      %24 = arith.divf %22, %23 : vector<32x128xf32>
      %c0_10 = arith.constant 0 : index
      %c0_11 = arith.constant 0 : index
      %25 = vector.load %arg3[%c0_10, %c0_11] : memref<32x128xf32, #tpu.memory_space<vmem>>, vector<32x128xf32>
      %26 = vector.shape_cast %24 : vector<32x128xf32> to vector<4x8x128xf32>
      %27 = vector.shape_cast %25 : vector<32x128xf32> to vector<4x8x128xf32>
      %c0_12 = arith.constant 0 : index
      %c0_13 = arith.constant 0 : index
      %28 = vector.load %arg5[%c0_12, %c0_13] : memref<8x128xf32, #tpu.memory_space<vmem>>, vector<8x128xf32>
      %29 = arith.mulf %26, %27 : vector<4x8x128xf32>
      %cst_14 = arith.constant dense<0.000000e+00> : vector<8x128xf32>
      %30 = vector.multi_reduction <add>, %29, %cst_14 [0] : vector<4x8x128xf32> to vector<8x128xf32>
      %31 = arith.addf %28, %30 : vector<8x128xf32>
      %c0_15 = arith.constant 0 : index
      %c0_16 = arith.constant 0 : index
      %32 = vector.load %arg5[%c0_15, %c0_16] : memref<8x128xf32, #tpu.memory_space<vmem>>, vector<8x128xf32>
      tpu.vector_store %arg5[%c0_15, %c0_16], %31 {strides = array<i32>} : memref<8x128xf32, #tpu.memory_space<vmem>>, vector<8x128xf32>,
      %c0_17 = arith.constant 0 : index
      %c0_18 = arith.constant 0 : index
      %33 = vector.load %arg6[%c0_17, %c0_18] : memref<8x128xf32, #tpu.memory_space<vmem>>, vector<8x128xf32>
      %cst_19 = arith.constant dense<0.000000e+00> : vector<8x128xf32>
      %34 = vector.multi_reduction <add>, %26, %cst_19 [0] : vector<4x8x128xf32> to vector<8x128xf32>
      %35 = arith.addf %33, %34 : vector<8x128xf32>
      %c0_20 = arith.constant 0 : index
      %c0_21 = arith.constant 0 : index
      %36 = vector.load %arg6[%c0_20, %c0_21] : memref<8x128xf32, #tpu.memory_space<vmem>>, vector<8x128xf32>
      tpu.vector_store %arg6[%c0_20, %c0_21], %35 {strides = array<i32>} : memref<8x128xf32, #tpu.memory_space<vmem>>, vector<8x128xf32>,
      %c0_22 = arith.constant 0 : index
      %c0_23 = arith.constant 0 : index
      %37 = vector.load %arg7[%c0_22, %c0_23] : memref<8x128xf32, #tpu.memory_space<vmem>>, vector<8x128xf32>
      %cst_24 = arith.constant dense<0.000000e+00> : vector<8x128xf32>
      %38 = vector.multi_reduction <add>, %27, %cst_24 [0] : vector<4x8x128xf32> to vector<8x128xf32>
      %39 = arith.addf %37, %38 : vector<8x128xf32>
      %c0_25 = arith.constant 0 : index
      %c0_26 = arith.constant 0 : index
      %40 = vector.load %arg7[%c0_25, %c0_26] : memref<8x128xf32, #tpu.memory_space<vmem>>, vector<8x128xf32>
      tpu.vector_store %arg7[%c0_25, %c0_26], %39 {strides = array<i32>} : memref<8x128xf32, #tpu.memory_space<vmem>>, vector<8x128xf32>,
    } else {
    }
    %c2_i32_3 = arith.constant 2 : i32
    %10 = arith.cmpi slt, %2, %c2_i32_3 : i32
    %c32_i32_4 = arith.constant 32 : i32
    %11 = arith.addi %2, %c32_i32_4 : i32
    %c2_i32_5 = arith.constant 2 : i32
    %12 = arith.cmpi sgt, %11, %c2_i32_5 : i32
    %13 = arith.andi %10, %12 : i1
    %14 = arith.extui %13 : i1 to i32
    %c0_i32_6 = arith.constant 0 : i32
    %15 = arith.cmpi ne, %14, %c0_i32_6 : i32
    scf.if %15 {
      %19 = tpu.iota {dimensions = array<i32: 0>} : vector<32x128xi32>
      %20 = vector.broadcast %2 : i32 to vector<32x128xi32>
      %21 = arith.addi %20, %19 : vector<32x128xi32>
      %c2_i32_9 = arith.constant 2 : i32
      %22 = vector.broadcast %c2_i32_9 : i32 to vector<32x128xi32>
      %23 = arith.cmpi slt, %21, %22 : vector<32x128xi32>
      %24 = arith.extui %23 : vector<32x128xi1> to vector<32x128xi32>
      %25 = arith.sitofp %24 : vector<32x128xi32> to vector<32x128xf32>
      %c0 = arith.constant 0 : index
      %c0_10 = arith.constant 0 : index
      %26 = vector.load %arg2[%c0, %c0_10] : memref<32x128xf32, #tpu.memory_space<vmem>>, vector<32x128xf32>
      %27 = arith.negf %26 : vector<32x128xf32>
      %28 = math.exp %27 : vector<32x128xf32>
      %cst = arith.constant 1.000000e+00 : f32
      %29 = vector.broadcast %cst : f32 to vector<32x128xf32>
      %30 = arith.addf %29, %28 : vector<32x128xf32>
      %31 = arith.divf %29, %30 : vector<32x128xf32>
      %32 = arith.mulf %31, %25 : vector<32x128xf32>
      %c0_11 = arith.constant 0 : index
      %c0_12 = arith.constant 0 : index
      %33 = vector.load %arg3[%c0_11, %c0_12] : memref<32x128xf32, #tpu.memory_space<vmem>>, vector<32x128xf32>
      %34 = arith.mulf %33, %25 : vector<32x128xf32>
      %35 = vector.shape_cast %32 : vector<32x128xf32> to vector<4x8x128xf32>
      %36 = vector.shape_cast %34 : vector<32x128xf32> to vector<4x8x128xf32>
      %c0_13 = arith.constant 0 : index
      %c0_14 = arith.constant 0 : index
      %37 = vector.load %arg5[%c0_13, %c0_14] : memref<8x128xf32, #tpu.memory_space<vmem>>, vector<8x128xf32>
      %38 = arith.mulf %35, %36 : vector<4x8x128xf32>
      %cst_15 = arith.constant dense<0.000000e+00> : vector<8x128xf32>
      %39 = vector.multi_reduction <add>, %38, %cst_15 [0] : vector<4x8x128xf32> to vector<8x128xf32>
      %40 = arith.addf %37, %39 : vector<8x128xf32>
      %c0_16 = arith.constant 0 : index
      %c0_17 = arith.constant 0 : index
      %41 = vector.load %arg5[%c0_16, %c0_17] : memref<8x128xf32, #tpu.memory_space<vmem>>, vector<8x128xf32>
      tpu.vector_store %arg5[%c0_16, %c0_17], %40 {strides = array<i32>} : memref<8x128xf32, #tpu.memory_space<vmem>>, vector<8x128xf32>,
      %c0_18 = arith.constant 0 : index
      %c0_19 = arith.constant 0 : index
      %42 = vector.load %arg6[%c0_18, %c0_19] : memref<8x128xf32, #tpu.memory_space<vmem>>, vector<8x128xf32>
      %cst_20 = arith.constant dense<0.000000e+00> : vector<8x128xf32>
      %43 = vector.multi_reduction <add>, %35, %cst_20 [0] : vector<4x8x128xf32> to vector<8x128xf32>
      %44 = arith.addf %42, %43 : vector<8x128xf32>
      %c0_21 = arith.constant 0 : index
      %c0_22 = arith.constant 0 : index
      %45 = vector.load %arg6[%c0_21, %c0_22] : memref<8x128xf32, #tpu.memory_space<vmem>>, vector<8x128xf32>
      tpu.vector_store %arg6[%c0_21, %c0_22], %44 {strides = array<i32>} : memref<8x128xf32, #tpu.memory_space<vmem>>, vector<8x128xf32>,
      %c0_23 = arith.constant 0 : index
      %c0_24 = arith.constant 0 : index
      %46 = vector.load %arg7[%c0_23, %c0_24] : memref<8x128xf32, #tpu.memory_space<vmem>>, vector<8x128xf32>
      %cst_25 = arith.constant dense<0.000000e+00> : vector<8x128xf32>
      %47 = vector.multi_reduction <add>, %36, %cst_25 [0] : vector<4x8x128xf32> to vector<8x128xf32>
      %48 = arith.addf %46, %47 : vector<8x128xf32>
      %c0_26 = arith.constant 0 : index
      %c0_27 = arith.constant 0 : index
      %49 = vector.load %arg7[%c0_26, %c0_27] : memref<8x128xf32, #tpu.memory_space<vmem>>, vector<8x128xf32>
      tpu.vector_store %arg7[%c0_26, %c0_27], %48 {strides = array<i32>} : memref<8x128xf32, #tpu.memory_space<vmem>>, vector<8x128xf32>,
    } else {
    }
    %c0_i32_7 = arith.constant 0 : i32
    %16 = arith.cmpi eq, %arg1, %c0_i32_7 : i32
    %17 = arith.extui %16 : i1 to i32
    %c0_i32_8 = arith.constant 0 : i32
    %18 = arith.cmpi ne, %17, %c0_i32_8 : i32
    scf.if %18 {
      %c0 = arith.constant 0 : index
      %c0_9 = arith.constant 0 : index
      %19 = vector.load %arg5[%c0, %c0_9] : memref<8x128xf32, #tpu.memory_space<vmem>>, vector<8x128xf32>
      %c0_10 = arith.constant 0 : index
      %c0_11 = arith.constant 0 : index
      %c0_12 = arith.constant 0 : index
      %c0_13 = arith.constant 0 : index
      %20 = vector.load %arg4[%c0_10, %c0_11, %c0_12, %c0_13] : memref<1x3x8x128xf32, #tpu.memory_space<vmem>>, vector<1x1x8x128xf32>
      %21 = vector.shape_cast %20 : vector<1x1x8x128xf32> to vector<8x128xf32>
      %22 = vector.shape_cast %19 : vector<8x128xf32> to vector<1x1x8x128xf32>
      tpu.vector_store %arg4[%c0_10, %c0_11, %c0_12, %c0_13], %22 {strides = array<i32>} : memref<1x3x8x128xf32, #tpu.memory_space<vmem>>, vector<1x1x8x128xf32>,
      %c0_14 = arith.constant 0 : index
      %c0_15 = arith.constant 0 : index
      %23 = vector.load %arg6[%c0_14, %c0_15] : memref<8x128xf32, #tpu.memory_space<vmem>>, vector<8x128xf32>
      %c0_16 = arith.constant 0 : index
      %c1 = arith.constant 1 : index
      %c0_17 = arith.constant 0 : index
      %c0_18 = arith.constant 0 : index
      %24 = vector.load %arg4[%c0_16, %c1, %c0_17, %c0_18] : memref<1x3x8x128xf32, #tpu.memory_space<vmem>>, vector<1x1x8x128xf32>
      %25 = vector.shape_cast %24 : vector<1x1x8x128xf32> to vector<8x128xf32>
      %26 = vector.shape_cast %23 : vector<8x128xf32> to vector<1x1x8x128xf32>
      tpu.vector_store %arg4[%c0_16, %c1, %c0_17, %c0_18], %26 {strides = array<i32>} : memref<1x3x8x128xf32, #tpu.memory_space<vmem>>, vector<1x1x8x128xf32>,
      %c0_19 = arith.constant 0 : index
      %c0_20 = arith.constant 0 : index
      %27 = vector.load %arg7[%c0_19, %c0_20] : memref<8x128xf32, #tpu.memory_space<vmem>>, vector<8x128xf32>
      %c0_21 = arith.constant 0 : index
      %c2 = arith.constant 2 : index
      %c0_22 = arith.constant 0 : index
      %c0_23 = arith.constant 0 : index
      %28 = vector.load %arg4[%c0_21, %c2, %c0_22, %c0_23] : memref<1x3x8x128xf32, #tpu.memory_space<vmem>>, vector<1x1x8x128xf32>
      %29 = vector.shape_cast %28 : vector<1x1x8x128xf32> to vector<8x128xf32>
      %30 = vector.shape_cast %27 : vector<8x128xf32> to vector<1x1x8x128xf32>
      tpu.vector_store %arg4[%c0_21, %c2, %c0_22, %c0_23], %30 {strides = array<i32>} : memref<1x3x8x128xf32, #tpu.memory_space<vmem>>, vector<1x1x8x128xf32>,
    } else {
    }
    return
  }
  func.func @transform_0(%arg0: i32, %arg1: i32) -> (i32, i32) {
    %c1_i32 = arith.constant 1 : i32
    %0 = arith.muli %arg0, %c1_i32 : i32
    %1 = arith.addi %0, %arg1 : i32
    %c0_i32 = arith.constant 0 : i32
    %2 = arith.minsi %1, %c0_i32 : i32
    %c0_i32_0 = arith.constant 0 : i32
    %c0_i32_1 = arith.constant 0 : i32
    return %2, %c0_i32_0 : i32, i32
  }
  func.func @transform_1(%arg0: i32, %arg1: i32) -> (i32, i32) {
    %c1_i32 = arith.constant 1 : i32
    %0 = arith.muli %arg0, %c1_i32 : i32
    %1 = arith.addi %0, %arg1 : i32
    %c0_i32 = arith.constant 0 : i32
    %2 = arith.minsi %1, %c0_i32 : i32
    %c0_i32_0 = arith.constant 0 : i32
    %c0_i32_1 = arith.constant 0 : i32
    return %2, %c0_i32_0 : i32, i32
  }
  func.func @transform_2(%arg0: i32, %arg1: i32) -> (i32, i32, i32, i32) {
    %c0_i32 = arith.constant 0 : i32
    %c0_i32_0 = arith.constant 0 : i32
    %c0_i32_1 = arith.constant 0 : i32
    %c0_i32_2 = arith.constant 0 : i32
    return %arg0, %c0_i32, %c0_i32_0, %c0_i32_1 : i32, i32, i32, i32
  }
}

</mosaic_0001>

<bundles_post_ra>
// kernel: tpu_custom_call.1
= control target key start
LH: loop header
LB: loop body
LE: loop exit
PB: predicated region body
PF: predicated region fallthrough
CT: control target
= control target key end

     0   :  { %7 = vsyncpa [#allocation6], 0  ;;  %s394_s0 = inlined_call_operand.hbm [shape: f32[2,128], index: 0, kind: input, shape index: {}]   ;;  %s395_s1 = inlined_call_operand.hbm [shape: f32[2,128], index: 1, kind: input, shape index: {}]   ;;  %s396_s2 = inlined_call_operand.hbm [shape: f32[1,3,8,128], index: 2, kind: output, shape index: {}]  }
   0x1   :  { %8 = vsyncpa [#allocation9], 0 }
   0x2   :  { %9 = vsyncpa [#allocation7], 0 }
   0x3   :  { %20 = vsyncadd [#allocation6], 480  ;;  %s362_s9 = smov [#allocation5]  }
   0x4   :  { %s25_s10 = sshll.u32 %s362_s9, 4  ;;  %s26_s10 = int_to_ptr.vmem [resolvable:$true] %s25_s10 }
   0x5   :  { %s304_s11 = scalar_lea.vmem %s26_s10, 32  ;;  %s308_s12 = scalar_lea.vmem %s26_s10, 512 }
   0x6   :  { %p305_p0 = scmp.ne.s32.totalorder %s26_s10, %s304_s11  ;;  %p309_p1 = scmp.lt.s32.totalorder %s26_s10, %s26_s10 }
   0x7   :  { %p310_p2 = scmp.lt.s32.totalorder %s308_s12, %s304_s11 }
   0x9   :  { %p311_p3 = por %p310_p2, %p309_p1 }
   0xb   :  { %p312_p4 = pnand %p311_p3, %p305_p0 }
   0xd   :  { %315 = shalt.err (!%p312_p4)
}
   0xe   :  { %s363_s13 = smov 32   ;;  %s364_s14 = smov 2  }
   0xf   :  { %31 = dma.hbm_to_vmem [thread:$0]  %s394_s0, 32, %s26_s10, [#allocation6], %s363_s13, %s363_s13, %s364_s14  }
  0x10   :  { %42 = vsyncadd [#allocation9], 480  ;;  %s365_s17 = smov [#allocation8]  }
  0x11   :  { %s47_s18 = sshll.u32 %s365_s17, 4  ;;  %s48_s18 = int_to_ptr.vmem [resolvable:$true] %s47_s18 }
  0x12   :  { %s324_s19 = scalar_lea.vmem %s48_s18, 32  ;;  %s328_s20 = scalar_lea.vmem %s48_s18, 512 }
  0x13   :  { %p325_p5 = scmp.ne.s32.totalorder %s48_s18, %s324_s19  ;;  %p329_p6 = scmp.lt.s32.totalorder %s48_s18, %s48_s18 }
  0x14   :  { %p330_p7 = scmp.lt.s32.totalorder %s328_s20, %s324_s19 }
  0x16   :  { %p331_p8 = por %p330_p7, %p329_p6 }
  0x18   :  { %p332_p9 = pnand %p331_p8, %p325_p5 }
  0x1a   :  { %335 = shalt.err (!%p332_p9)
}
  0x1b   :  { %53 = dma.hbm_to_vmem [thread:$0]  %s395_s1, 32, %s48_s18, [#allocation9], %s363_s13, %s363_s13, %s364_s14  }
  0x1c   :  { %356 = dma.done.wait [#allocation6], 512  }
  0x1d   :  { %357 = vsyncadd [#allocation6], 4294966784 }
  0x1e   :  { %358 = dma.done.wait [#allocation9], 512  }
  0x1f   :  { %359 = vsyncadd [#allocation9], 4294966784  ;;  %v146_v0 = vlaneseq  ;;  %v366_v2 = vmov 0.0   ;;  %v168_v4 = vld [vmem:[#allocation5] sm:$0xff]  ;;  %v169_v5 = vld [vmem:[#allocation5 + $0x8] sm:$0xff]  ;;  %s367_s0 = smov [#allocation10]  }
  0x20   :  { %v170_v6 = vld [vmem:[#allocation5 + $0x10] sm:$0xff]  ;;  %v171_v7 = vld [vmem:[#allocation5 + $0x18] sm:$0xff]  ;;  %v268_v8 = vmul.f32 -1.442695, %v168_v4  ;;  %v269_v9 = vmul.f32 -1.442695, %v169_v5 }
  0x21   :  { %v147_v1 = vshrl.u32 %v146_v0, 7  ;;  %v200_v10 = vld [vmem:[#allocation8] sm:$0xff]  ;;  %v270_v11 = vmul.f32 -1.442695, %v170_v6  ;;  %v271_v12 = vmul.f32 -1.442695, %v171_v7 }
  0x22   :  { %v201_v13 = vld [vmem:[#allocation8 + $0x8] sm:$0xff]  ;;  %v202_v14 = vld [vmem:[#allocation8 + $0x10] sm:$0xff]  ;;  %280 = vpow2.f32 %v268_v8  ;;  %v203_v17 = vld [vmem:[#allocation8 + $0x18] sm:$0xff]  ;;  %s246_s1 = sshll.u32 %s367_s0, 4  ;;  %s247_s1 = int_to_ptr.vmem [resolvable:$true] %s246_s1 }
  0x23   :  { %vm156_vm0 = vcmp.lt.s32.totalorder %v147_v1, 2  ;;  %v205_v16 = vmul.f32 0.0, %v201_v13  ;;  %282 = vpow2.f32 %v269_v9  ;;  %v206_v18 = vmul.f32 0.0, %v202_v14  ;;  %s336_s23 = scalar_lea.vmem %s247_s1, 384  ;;  %p341_p11 = scmp.lt.s32.totalorder %s247_s1, %s247_s1 }
  0x24   :  { %v267_v3 = vsel %vm156_vm0, 1.0, %v366_v2  ;;  %284 = vpow2.f32 %v270_v11  ;;  %v207_v20 = vmul.f32 0.0, %v203_v17  ;;  %p337_p10 = scmp.ne.s32.totalorder %s247_s1, %s336_s23  ;;  %p342_p12 = scmp.lt.s32.totalorder %s336_s23, %s336_s23 }
  0x25   :  { %v204_v15 = vmul.f32 %v267_v3, %v200_v10  ;;  %286 = vpow2.f32 %v271_v12 }
  0x26   :  { %p343_p13 = por %p342_p12, %p341_p11 }
  0x27   :  { %v225_v19 = vadd.f32 %v205_v16, %v204_v15 }
  0x28   :  { %p344_p0 = pnand %p343_p13, %p337_p10 }
  0x29   :  { %v226_v21 = vadd.f32 %v225_v19, %v206_v18 }
  0x2b   :  { %v227_v22 = vadd.f32 %v226_v21, %v207_v20 }
  0x2d   :  { %240 = vst [vmem:[#allocation10 + $0x10] sm:$0xff] %v227_v22 }
  0x2f   :  { %v281_v23 = vpop.eup %280 }
  0x30   :  { %v283_v24 = vpop.eup %282  ;;  %v184_v25 = vadd.f32 1.0, %v281_v23 }
  0x31   :  { %v285_v26 = vpop.eup %284  ;;  %v185_v27 = vadd.f32 1.0, %v283_v24 }
  0x32   :  { %v287_v28 = vpop.eup %286  ;;  %v186_v29 = vadd.f32 1.0, %v285_v26  ;;  %288 = vrcp.f32 %v184_v25 }
  0x33   :  { %v187_v30 = vadd.f32 1.0, %v287_v28  ;;  %290 = vrcp.f32 %v185_v27 }
  0x34   :  { %292 = vrcp.f32 %v186_v29 }
  0x35   :  { %294 = vrcp.f32 %v187_v30 }
  0x3f   :  { %v289_v31 = vpop.eup %288 }
  0x40   :  { %v291_v32 = vpop.eup %290  ;;  %v196_v33 = vmul.f32 %v289_v31, %v267_v3 }
  0x41   :  { %v293_v34 = vpop.eup %292  ;;  %v197_v35 = vmul.f32 0.0, %v291_v32 }
  0x42   :  { %v295_v36 = vpop.eup %294  ;;  %v198_v37 = vmul.f32 0.0, %v293_v34  ;;  %v209_v38 = vmul.f32 %v204_v15, %v196_v33 }
  0x43   :  { %v199_v39 = vmul.f32 0.0, %v295_v36  ;;  %v210_v40 = vmul.f32 %v205_v16, %v197_v35  ;;  %v219_v41 = vadd.f32 %v197_v35, %v196_v33 }
  0x44   :  { %v211_v42 = vmul.f32 %v206_v18, %v198_v37 }
  0x45   :  { %v212_v43 = vmul.f32 %v207_v20, %v199_v39  ;;  %v213_v44 = vadd.f32 %v210_v40, %v209_v38  ;;  %v220_v45 = vadd.f32 %v219_v41, %v198_v37 }
  0x47   :  { %v214_v46 = vadd.f32 %v213_v44, %v211_v42  ;;  %v221_v47 = vadd.f32 %v220_v45, %v199_v39 }
  0x49   :  { %v215_v48 = vadd.f32 %v214_v46, %v212_v43  ;;  %237 = vst [vmem:[#allocation10 + $0x8] sm:$0xff] %v221_v47 }
  0x4b   :  { %234 = vst [vmem:[#allocation10] sm:$0xff] %v215_v48 }
  0x4c   :  { %347 = shalt.err (!%p344_p0)
}
  0x4d   :  { %s368_s24 = smov 128   ;;  %s369_s25 = smov 8  }
  0x4e   :  { %252 = dma.vmem_to_hbm [thread:$0]  %s247_s1, 384, %s396_s2, [#allocation7], %s368_s24, %s368_s24, %s369_s25  }
  0x4f   :  { %360 = dma.done.wait [#allocation7], 384  }
  0x50   :  { %361 = vsyncadd [#allocation7], 4294966912 }
  0x51   :  { %256 = vsyncpa [#allocation6], 1 }
  0x52   :  { %257 = vsyncpa [#allocation9], 1 }
  0x53   :  { %258 = vsyncpa [#allocation7], 1 }

</bundles_post_ra>
